<compile_context>
chip_gen: v6e
topology: v6e:2x2x1
jax: 0.10.0
libtpu: 0.0.40
codegen_flags: <defaults>
</compile_context>

<pallas_src>
import functools

import jax
import jax.numpy as jnp
from jax import lax
from jax.experimental import pallas as pl
from jax.experimental.pallas import tpu as pltpu


def _round_up(x, m):
    return ((x + m - 1) // m) * m


def _cross_entropy_kernel(logits_ref, labels_ref, out_ref, acc_ref, *, n_total, tile_n):
    # logits_ref: (tile_n, C) native dtype in VMEM
    # labels_ref: (tile_n, 1) int32   in VMEM
    # out_ref:    (1, 1)      float32 in VMEM (written once, at the last step)
    # acc_ref:    (1, 1)      float32 VMEM scratch accumulator
    pid = pl.program_id(0)

    @pl.when(pid == 0)
    def _():
        acc_ref[...] = jnp.zeros_like(acc_ref)

    # Cast once per tile inside the kernel (inputs stay native-dtype in HBM).
    logits = logits_ref[...].astype(jnp.float32)                   # (tile_n, C)
    labels = labels_ref[...]                                       # (tile_n, 1) int32

    # Numerically stable logsumexp per row.
    row_max = jnp.max(logits, axis=-1, keepdims=True)              # (tile_n, 1)
    shifted = logits - row_max                                     # (tile_n, C)
    sum_exp = jnp.sum(jnp.exp(shifted), axis=-1, keepdims=True)    # (tile_n, 1)

    # Pick the *shifted* target logit: the row_max terms cancel exactly, so
    #   per_example = log(sum_exp) - shifted[target].
    class_ids = lax.broadcasted_iota(jnp.int32, shifted.shape, 1)  # (tile_n, C)
    picked = jnp.sum(
        jnp.where(class_ids == labels, shifted, 0.0),
        axis=-1, keepdims=True)                                    # (tile_n, 1)

    per_example = jnp.log(sum_exp) - picked                        # (tile_n, 1)

    # Mask rows past the true batch size (possibly partial last tile).
    row_ids = pid * tile_n + lax.broadcasted_iota(jnp.int32, per_example.shape, 0)
    per_example = jnp.where(row_ids < n_total, per_example, 0.0)

    # On-chip accumulation of the batch sum.
    acc_ref[...] += jnp.sum(per_example, axis=0, keepdims=True)    # (1, 1)

    @pl.when(pid == pl.num_programs(0) - 1)
    def _():
        out_ref[...] = acc_ref[...] * (1.0 / jnp.float32(n_total))


def cross_entropy_loss(output, label, *, tile_n=128):
    """Pallas equivalent of F.cross_entropy(output, label.long()), reduction='mean'.

    output: (N, C) float array of logits (any float dtype; cast to f32 in-kernel)
    label:  (N,)   integer array of class indices
    returns: scalar float32 loss
    """
    n, c = output.shape
    # Keep the batch tile a multiple of 8 (sublane) and no larger than needed.
    tile_n = min(tile_n, _round_up(n, 8))
    grid = (pl.cdiv(n, tile_n),)

    labels_2d = label.astype(jnp.int32).reshape(n, 1)
    kernel = functools.partial(_cross_entropy_kernel, n_total=n, tile_n=tile_n)

    out = pl.pallas_call(
        kernel,
        out_shape=jax.ShapeDtypeStruct((1, 1), jnp.float32),
        grid=grid,
        in_specs=[
            pl.BlockSpec((tile_n, c), lambda i: (i, 0)),
            pl.BlockSpec((tile_n, 1), lambda i: (i, 0)),
        ],
        out_specs=pl.BlockSpec((1, 1), lambda i: (0, 0)),
        scratch_shapes=[pltpu.VMEM((1, 1), jnp.float32)],
        compiler_params=pltpu.CompilerParams(
            dimension_semantics=("arbitrary",),  # scalar accumulator across tiles
        ),
    )(output, labels_2d)
    return out[0, 0]


def _ref_loss(logits, labels):
    lg = logits.astype(jnp.float32)
    lse = jax.nn.logsumexp(lg, axis=-1)
    picked = jnp.take_along_axis(lg, labels[:, None].astype(jnp.int32), axis=-1)[:, 0]
    return jnp.mean(lse - picked)


if __name__ == "__main__":
    key = jax.random.PRNGKey(0)
    k1, k2, k3, k4 = jax.random.split(key, 4)

    # Case 1: float32 logits, batch not a multiple of 8 (exercises row masking).
    N1, C1 = 10, 33
    logits1 = jax.random.normal(k1, (N1, C1), dtype=jnp.float32)
    labels1 = jax.random.randint(k2, (N1,), 0, C1, dtype=jnp.int32)
    loss1 = cross_entropy_loss(logits1, labels1)
    jax.block_until_ready(loss1)
    ref1 = _ref_loss(logits1, labels1)
    assert jnp.allclose(loss1, ref1, atol=1e-5, rtol=1e-5), (loss1, ref1)

    # Case 2: bf16 logits (native dtype fed straight to the kernel), multiple
    # grid steps with a partial last tile (exercises the accumulator + mask).
    N2, C2 = 20, 160
    logits2 = jax.random.normal(k3, (N2, C2), dtype=jnp.bfloat16)
    labels2 = jax.random.randint(k4, (N2,), 0, C2, dtype=jnp.int32)
    loss2 = cross_entropy_loss(logits2, labels2, tile_n=8)
    jax.block_until_ready(loss2)
    ref2 = _ref_loss(logits2, labels2)
    assert jnp.allclose(loss2, ref2, atol=1e-4, rtol=1e-4), (loss2, ref2)

    print("KERNEL_OK")
</pallas_src>

<mosaic_0001>
module attributes {stable_mosaic.version = 11 : i64} {
  func.func @_cross_entropy_kernel(%arg0: i32, %arg1: memref<16x33xf32, #tpu.memory_space<vmem>>, %arg2: memref<16x1xi32, #tpu.memory_space<vmem>>, %arg3: memref<1x1xf32, #tpu.memory_space<vmem>>, %arg4: memref<1x1xf32, #tpu.memory_space<vmem>>) attributes {dimension_semantics = [#tpu.dimension_semantics<arbitrary>], iteration_bounds = array<i64: 1>, scalar_prefetch = 0 : i64, scratch_operands = 1 : i64, tpu.core_type = #tpu.core_type<tc>, window_params = [{transform_indices = @transform_0, window_bounds = array<i64: 16, 33>}, {transform_indices = @transform_1, window_bounds = array<i64: 16, 1>}, {pipeline_mode = #tpu.pipeline_mode<synchronous>, transform_indices = @transform_2, window_bounds = array<i64: 1, 1>}]} {
    %c0_i32 = arith.constant 0 : i32
    %0 = arith.cmpi eq, %arg0, %c0_i32 : i32
    %1 = arith.extui %0 : i1 to i32
    %c0_i32_0 = arith.constant 0 : i32
    %2 = arith.cmpi ne, %1, %c0_i32_0 : i32
    scf.if %2 {
      %cst_15 = arith.constant 0.000000e+00 : f32
      %37 = vector.broadcast %cst_15 : f32 to vector<1x1xf32>
      %c0_16 = arith.constant 0 : index
      %c0_17 = arith.constant 0 : index
      %38 = vector.load %arg4[%c0_16, %c0_17] : memref<1x1xf32, #tpu.memory_space<vmem>>, vector<1x1xf32>
      tpu.vector_store %arg4[%c0_16, %c0_17], %37 {strides = array<i32>} : memref<1x1xf32, #tpu.memory_space<vmem>>, vector<1x1xf32>,
    } else {
    }
    %c0 = arith.constant 0 : index
    %c0_1 = arith.constant 0 : index
    %3 = vector.load %arg1[%c0, %c0_1] : memref<16x33xf32, #tpu.memory_space<vmem>>, vector<16x33xf32>
    %c0_2 = arith.constant 0 : index
    %c0_3 = arith.constant 0 : index
    %4 = vector.load %arg2[%c0_2, %c0_3] : memref<16x1xi32, #tpu.memory_space<vmem>>, vector<16x1xi32>
    %cst = arith.constant dense<0xFF800000> : vector<16xf32>
    %5 = vector.multi_reduction <maximumf>, %3, %cst [1] : vector<16x33xf32> to vector<16xf32>
    %6 = vector.shape_cast %5 : vector<16xf32> to vector<16x1xf32>
    %7 = vector.broadcast %6 : vector<16x1xf32> to vector<16x33xf32>
    %8 = arith.subf %3, %7 : vector<16x33xf32>
    %9 = math.exp %8 : vector<16x33xf32>
    %cst_4 = arith.constant dense<0.000000e+00> : vector<16xf32>
    %10 = vector.multi_reduction <add>, %9, %cst_4 [1] : vector<16x33xf32> to vector<16xf32>
    %11 = vector.shape_cast %10 : vector<16xf32> to vector<16x1xf32>
    %12 = tpu.iota {dimensions = array<i32: 1>} : vector<16x33xi32>
    %13 = vector.broadcast %4 : vector<16x1xi32> to vector<16x33xi32>
    %14 = arith.cmpi eq, %12, %13 : vector<16x33xi32>
    %cst_5 = arith.constant 0.000000e+00 : f32
    %15 = vector.broadcast %cst_5 : f32 to vector<16x33xf32>
    %16 = arith.select %14, %8, %15 : vector<16x33xi1>, vector<16x33xf32>
    %cst_6 = arith.constant dense<0.000000e+00> : vector<16xf32>
    %17 = vector.multi_reduction <add>, %16, %cst_6 [1] : vector<16x33xf32> to vector<16xf32>
    %18 = vector.shape_cast %17 : vector<16xf32> to vector<16x1xf32>
    %19 = math.log %11 : vector<16x1xf32>
    %20 = arith.subf %19, %18 : vector<16x1xf32>
    %c16_i32 = arith.constant 16 : i32
    %21 = arith.muli %arg0, %c16_i32 : i32
    %22 = tpu.iota {dimensions = array<i32: 0>} : vector<16x1xi32>
    %23 = vector.broadcast %21 : i32 to vector<16x1xi32>
    %24 = arith.addi %23, %22 : vector<16x1xi32>
    %c10_i32 = arith.constant 10 : i32
    %25 = vector.broadcast %c10_i32 : i32 to vector<16x1xi32>
    %26 = arith.cmpi slt, %24, %25 : vector<16x1xi32>
    %cst_7 = arith.constant 0.000000e+00 : f32
    %27 = vector.broadcast %cst_7 : f32 to vector<16x1xf32>
    %28 = arith.select %26, %20, %27 : vector<16x1xi1>, vector<16x1xf32>
    %c0_8 = arith.constant 0 : index
    %c0_9 = arith.constant 0 : index
    %29 = vector.load %arg4[%c0_8, %c0_9] : memref<1x1xf32, #tpu.memory_space<vmem>>, vector<1x1xf32>
    %cst_10 = arith.constant dense<0.000000e+00> : vector<1xf32>
    %30 = vector.multi_reduction <add>, %28, %cst_10 [0] : vector<16x1xf32> to vector<1xf32>
    %31 = vector.shape_cast %30 : vector<1xf32> to vector<1x1xf32>
    %32 = arith.addf %29, %31 : vector<1x1xf32>
    %c0_11 = arith.constant 0 : index
    %c0_12 = arith.constant 0 : index
    %33 = vector.load %arg4[%c0_11, %c0_12] : memref<1x1xf32, #tpu.memory_space<vmem>>, vector<1x1xf32>
    tpu.vector_store %arg4[%c0_11, %c0_12], %32 {strides = array<i32>} : memref<1x1xf32, #tpu.memory_space<vmem>>, vector<1x1xf32>,
    %c0_i32_13 = arith.constant 0 : i32
    %34 = arith.cmpi eq, %arg0, %c0_i32_13 : i32
    %35 = arith.extui %34 : i1 to i32
    %c0_i32_14 = arith.constant 0 : i32
    %36 = arith.cmpi ne, %35, %c0_i32_14 : i32
    scf.if %36 {
      %c0_15 = arith.constant 0 : index
      %c0_16 = arith.constant 0 : index
      %37 = vector.load %arg4[%c0_15, %c0_16] : memref<1x1xf32, #tpu.memory_space<vmem>>, vector<1x1xf32>
      %cst_17 = arith.constant 1.000000e+00 : f32
      %cst_18 = arith.constant 1.000000e+01 : f32
      %38 = arith.divf %cst_17, %cst_18 : f32
      %39 = vector.broadcast %38 : f32 to vector<1x1xf32>
      %40 = arith.mulf %37, %39 : vector<1x1xf32>
      %c0_19 = arith.constant 0 : index
      %c0_20 = arith.constant 0 : index
      %41 = vector.load %arg3[%c0_19, %c0_20] : memref<1x1xf32, #tpu.memory_space<vmem>>, vector<1x1xf32>
      tpu.vector_store %arg3[%c0_19, %c0_20], %40 {strides = array<i32>} : memref<1x1xf32, #tpu.memory_space<vmem>>, vector<1x1xf32>,
    } else {
    }
    return
  }
  func.func @transform_0(%arg0: i32) -> (i32, i32) {
    %c0_i32 = arith.constant 0 : i32
    %c0_i32_0 = arith.constant 0 : i32
    return %arg0, %c0_i32 : i32, i32
  }
  func.func @transform_1(%arg0: i32) -> (i32, i32) {
    %c0_i32 = arith.constant 0 : i32
    %c0_i32_0 = arith.constant 0 : i32
    return %arg0, %c0_i32 : i32, i32
  }
  func.func @transform_2(%arg0: i32) -> (i32, i32) {
    %c0_i32 = arith.constant 0 : i32
    %c0_i32_0 = arith.constant 0 : i32
    %c0_i32_1 = arith.constant 0 : i32
    return %c0_i32, %c0_i32_0 : i32, i32
  }
}

</mosaic_0001>

<bundles_post_ra>
// kernel: tpu_custom_call.1
= control target key start
LH: loop header
LB: loop body
LE: loop exit
PB: predicated region body
PF: predicated region fallthrough
CT: control target
= control target key end

     0   :  { %vm22_vm0 = vcmask 269312   ;;  %v142_v4 = vmov 0   ;;  %s184_s0 = inlined_call_operand.vmem [shape: f32[10,33], index: 0, kind: input, shape index: {}]   ;;  %s185_s1 = inlined_call_operand.vmem [shape: s32[10,1], index: 1, kind: input, shape index: {}]   ;;  %s186_s2 = inlined_call_operand.hbm [shape: f32[1,1], index: 2, kind: output, shape index: {}]  }
   0x1   :  { %v19_v0 = vld [vmem:[%s184_s0 + $0x8] sm:$0xff]  ;;  %v18_v1 = vld [vmem:[%s184_s0] sm:$0xff]  ;;  %110 = vset.pattern.permute.xlu1 %v142_v4  ;;  %111 = vset.pattern.permute.xlu0 %v142_v4 }
   0x2   :  { %v21_v2 = vld [vmem:[%s185_s1 + $0x8] sm:$0xff]  ;;  %v26_v3 = vsel %vm22_vm0, %v19_v0, -inf }
   0x3   :  { %7 = vsyncpa [#allocation4], 0  ;;  %27 = vmax.xlane.f32.xlu0 %v26_v3  ;;  %47 = vperm.xlu1 %110, %v21_v2   ;;  %v23_v5 = vsel %vm22_vm0, %v18_v1, -inf  ;;  %v20_v6 = vld [vmem:[%s185_s1] sm:$0xff]  ;;  %v41_v13 = vlaneseq  ;;  %vm16_vm3 = vcmask 0   ;;  %v143_v25 = vmov 0.0  }
   0x4   :  { %17 = vst.msk [vmem:[#allocation2] sm:$0x1] %vm16_vm3, %v143_v25  ;;  %s144_s0 = smov [#allocation3]  }
   0x5   :  { %v42_v15 = vand.u32 127, %v41_v13  ;;  %v67_v28 = vshrl.u32 %v41_v13, 7  ;;  %s99_s1 = sshll.u32 %s144_s0, 4  ;;  %s100_s1 = int_to_ptr.vmem [resolvable:$true] %s99_s1 }
   0x6   :  { %s120_s17 = scalar_lea.vmem %s100_s1, 16  ;;  %s124_s18 = scalar_lea.vmem %s100_s1, 32 }
   0x7   :  { %24 = vmax.xlane.f32.xlu0 %v23_v5  ;;  %44 = vperm.xlu1 %110, %v20_v6   ;;  %v68_v32 = vadd.s32 8, %v67_v28  ;;  %p121_p0 = scmp.ne.s32.totalorder %s100_s1, %s120_s17  ;;  %p125_p1 = scmp.lt.s32.totalorder %s100_s1, %s100_s1 }
   0x8   :  { %p126_p2 = scmp.lt.s32.totalorder %s124_s18, %s120_s17 }
   0x9   :  { %vm73_vm4 = vcmp.lt.s32.totalorder %v68_v32, 10 }
   0xa   :  { %p127_p3 = por %p126_p2, %p125_p1 }
   0xb   :  { %v76_v45 = vld [vmem:[#allocation2] sm:$0x1] }
   0xc   :  { %p128_p4 = pnand %p127_p3, %p121_p0 }
  0x7e   :  { %v48_v14 = vpop.permute.xlu1 %47 }
  0x7f   :  { %vm50_vm1 = vcmp.eq.s32.totalorder %v42_v15, %v48_v14 }
  0x82   :  { %v45_v17 = vpop.permute.xlu1 %44 }
  0x83   :  { %vm49_vm2 = vcmp.eq.s32.totalorder %v42_v15, %v45_v17 }
  0x8c   :  { %v28_v7 = vpop.xlane.xlu0 %27 }
  0x8d   :  { %v30_v8 = vsub.f32 %v19_v0, %v28_v7 }
  0x8f   :  { %v33_v9 = vmul.f32 1.442695, %v30_v8  ;;  %v52_v19 = vsel %vm50_vm1, %v30_v8, 0.0 }
  0x90   :  { %v25_v10 = vpop.xlane.xlu0 %24  ;;  %v56_v21 = vsel %vm22_vm0, %v52_v19, 0.0 }
  0x91   :  { %112 = vpow2.f32 %v33_v9  ;;  %v29_v11 = vsub.f32 %v18_v1, %v25_v10 }
  0x93   :  { %v31_v12 = vmul.f32 1.442695, %v29_v11  ;;  %v51_v23 = vsel %vm49_vm2, %v29_v11, 0.0 }
  0x94   :  { %v53_v24 = vsel %vm22_vm0, %v51_v23, 0.0 }
  0x95   :  { %114 = vpow2.f32 %v31_v12 }
  0x9e   :  { %v113_v16 = vpop.eup %112 }
  0x9f   :  { %v38_v18 = vsel %vm22_vm0, %v113_v16, 0.0 }
  0xa0   :  { %39 = vadd.xlane.f32.xlu0 %v38_v18 }
  0xa2   :  { %v115_v20 = vpop.eup %114 }
  0xa3   :  { %v35_v22 = vsel %vm22_vm0, %v115_v20, 0.0 }
  0xa4   :  { %57 = vadd.xlane.f32.xlu0 %v56_v21  ;;  %36 = vadd.xlane.f32.xlu1 %v35_v22 }
  0xa8   :  { %54 = vadd.xlane.f32.xlu0 %v53_v24 }
 0x129   :  { %v40_v26 = vpop.xlane.xlu0 %39 }
 0x12a   :  { %116 = vlog2.f32 %v40_v26 }
 0x12d   :  { %v37_v27 = vpop.xlane.xlu1 %36  ;;  %v58_v30 = vpop.xlane.xlu0 %57 }
 0x12e   :  { %118 = vlog2.f32 %v37_v27 }
 0x131   :  { %v55_v36 = vpop.xlane.xlu0 %54 }
 0x137   :  { %v117_v29 = vpop.eup %116 }
 0x138   :  { %v62_v31 = vmul.f32 0.6931472, %v117_v29 }
 0x13a   :  { %v64_v34 = vsub.f32 %v62_v31, %v58_v30 }
 0x13b   :  { %v119_v33 = vpop.eup %118 }
 0x13c   :  { %v60_v35 = vmul.f32 0.6931472, %v119_v33  ;;  %v75_v38 = vsel %vm73_vm4, %v64_v34, 0.0 }
 0x13e   :  { %v63_v37 = vsub.f32 %v60_v35, %v55_v36 }
 0x140   :  { %v77_v39 = vadd.f32 %v75_v38, %v63_v37 }
 0x142   :  { %v78_v40 = vrot.slane %v77_v39, 4 }
 0x144   :  { %v79_v41 = vadd.f32 %v78_v40, %v77_v39 }
 0x146   :  { %v80_v42 = vrot.slane %v79_v41, 2 }
 0x148   :  { %v81_v43 = vadd.f32 %v80_v42, %v79_v41 }
 0x14a   :  { %v82_v44 = vrot.slane %v81_v43, 1 }
 0x14c   :  { %v83_v46 = vadd.f32 %v82_v44, %v81_v43 }
 0x14e   :  { %v84_v47 = vadd.f32 %v83_v46, %v76_v45 }
 0x150   :  { %86 = vst.msk [vmem:[#allocation2] sm:$0x1] %vm16_vm3, %v84_v47 }
 0x157   :  { %v90_v48 = vld [vmem:[#allocation2] sm:$0x1] }
 0x158   :  { %v91_v49 = vmul.f32 0.1, %v90_v48 }
 0x15a   :  { %92 = vst.msk [vmem:[#allocation3] sm:$0x1] %vm16_vm3, %v91_v49 }
 0x15b   :  { %131 = shalt.err (!%p128_p4)
}
 0x15c   :  { %102 = dma.vmem_to_hbm [thread:$0]  %s100_s1, 16, %s186_s2, [#allocation4]  }
 0x15d   :  { %140 = dma.done.wait [#allocation4], 16  }
 0x15e   :  { %141 = vsyncadd [#allocation4], 4294967280 }
 0x15f   :  { %106 = vsyncpa [#allocation4], 1 }

</bundles_post_ra>
